<compile_context>
chip_gen: v6e
topology: v6e:2x2x1
jax: 0.10.0
libtpu: 0.0.40
codegen_flags: <defaults>
</compile_context>

<pallas_src>
import functools

import jax
import jax.numpy as jnp
from jax import lax
from jax.experimental import pallas as pl
from jax.experimental.pallas import tpu as pltpu


def _round_up(v, m):
    return ((v + m - 1) // m) * m


def _clip_tile(desired, dim, unit):
    """Largest usable tile: the full dim if it fits, else a multiple of `unit`."""
    if dim <= desired:
        return dim
    return max(unit, (desired // unit) * unit)


# ---------------------------------------------------------------------------
# Kernel 1: support = x @ W^T + b   (nn.Linear).  Rows >= n_valid are forced
# to exactly zero so the padded tail of `support` never carries bias into the
# aggregation.
# ---------------------------------------------------------------------------
def _linear_kernel(x_ref, w_ref, b_ref, out_ref, *, n_valid, tm_lin, mask_rows):
    acc = jnp.dot(x_ref[...], w_ref[...], preferred_element_type=jnp.float32)
    acc = acc + b_ref[...]                               # [tm_lin,Fp] + [1,Fp]
    if mask_rows:                                        # static: only if pad rows exist
        row = pl.program_id(0) * tm_lin + lax.broadcasted_iota(
            jnp.int32, acc.shape, 0)
        acc = jnp.where(row < n_valid, acc, 0.0)
    out_ref[...] = acc.astype(out_ref.dtype)


# ---------------------------------------------------------------------------
# Kernel 2: out = adj @ support.
#   * adj streams straight from HBM in f32 (no host pad/cast copy); bf16 cast
#     happens in-register (VPU slack) right before the MXU dot.
#   * support is either fully VMEM-resident (sliced per k with pl.ds) or
#     streamed per contraction step.
#   * Output block index (i, 0) is constant across k -> accumulate directly
#     into out_ref (no scratch accumulator, contraction axis last, "arbitrary").
#   * Ragged contraction edge: adj columns >= n_valid are OOB reads
#     (unspecified values) -> masked to zero; only compiled in when needed.
# ---------------------------------------------------------------------------
def _aggregate_kernel(adj_ref, s_ref, out_ref, *, tk, n_valid, mask_cols,
                      support_resident):
    k = pl.program_id(1)

    @pl.when(k == 0)
    def _():
        out_ref[...] = jnp.zeros_like(out_ref)

    a = adj_ref[...]                                     # (tm, tk) f32 tile
    if mask_cols:                                        # static: only if n % tk != 0
        col = k * tk + lax.broadcasted_iota(jnp.int32, a.shape, 1)
        a = jnp.where(col < n_valid, a, 0.0)
    a = a.astype(jnp.bfloat16)                           # in-register cast

    if support_resident:
        start = pl.multiple_of(k * tk, tk)
        s = s_ref[pl.ds(start, tk), :]
    else:
        s = s_ref[...]

    out_ref[...] += jnp.dot(a, s, preferred_element_type=jnp.float32)


def gnn_layer(x, weight, bias, adj, *, tm=1024, tk=2048, tm_lin=1024,
              support_resident_max_bytes=12 * 1024 * 1024,
              vmem_limit_bytes=56 * 1024 * 1024):
    """GNNLayer.forward: adj @ (x @ weight.T + bias).

    x:      [N, F_in]  float32
    weight: [F_out, F_in]   (torch nn.Linear layout)
    bias:   [F_out]
    adj:    [N, N]     float32 (streamed as-is; never copied/padded on host)
    returns [N, F_out] float32

    Tuning notes:
      * Defaults (tm=1024, tk=2048, 56 MiB limit) keep the adj double-buffer at
        16 MiB f32 — safe on v7x (64 MiB VMEM).  On v5e/v6e (128 MiB) use
        tm=2048, tk=4096 and vmem_limit_bytes ~= 100 MiB for fewer grid steps.
      * Keep cdiv(N, tm) >= 2 (and even) on v7x so the "parallel" row axis
        shards across both TensorCores; bump the adj spec to
        pipeline_mode=pl.Buffered(3) only if xprof shows exposed DMA gaps.
    """
    n, f_in = x.shape
    f_out, f_in_w = weight.shape
    assert f_in_w == f_in and adj.shape == (n, n) and bias.shape == (f_out,)

    f_out_p = _round_up(f_out, 128)           # lane-dense support/output columns

    # Tiles clipped to the problem (full-dim blocks for small graphs).
    tm = _clip_tile(tm, n, 128)
    tk = _clip_tile(tk, n, 128)
    num_k = pl.cdiv(n, tk)
    n_sup = num_k * tk                        # support rows: multiple of tk so the
                                              # resident slice is always in-bounds
    tm_lin = _clip_tile(tm_lin, n_sup, 128)

    # --- small O(N*F) operands: padded/cast on host (adj never is) ------------
    cdt = jnp.bfloat16
    x_p = jnp.zeros((n_sup, f_in), cdt).at[:n, :].set(x.astype(cdt))
    w_t_p = jnp.zeros((f_in, f_out_p), cdt).at[:, :f_out].set(
        weight.T.astype(cdt))
    b_p = jnp.zeros((1, f_out_p), jnp.float32).at[0, :f_out].set(
        bias.astype(jnp.float32))

    # --- pallas_call 1: support = x @ W^T + b (computed once, kept bf16) ------
    lin_cost = pl.CostEstimate(
        flops=2 * n_sup * f_in * f_out_p,
        bytes_accessed=(x_p.size * 2 + w_t_p.size * 2 + b_p.size * 4
                        + n_sup * f_out_p * 2),
        transcendentals=0)
    support = pl.pallas_call(
        functools.partial(_linear_kernel, n_valid=n, tm_lin=tm_lin,
                          mask_rows=n_sup > n),
        out_shape=jax.ShapeDtypeStruct((n_sup, f_out_p), cdt),
        grid=(pl.cdiv(n_sup, tm_lin),),
        in_specs=[
            pl.BlockSpec((tm_lin, f_in), lambda i: (i, 0)),
            pl.BlockSpec((f_in, f_out_p), lambda i: (0, 0)),
            pl.BlockSpec((1, f_out_p), lambda i: (0, 0)),
        ],
        out_specs=pl.BlockSpec((tm_lin, f_out_p), lambda i: (i, 0)),
        compiler_params=pltpu.CompilerParams(
            dimension_semantics=("parallel",),
            vmem_limit_bytes=vmem_limit_bytes),
        cost_estimate=lin_cost,
    )(x_p, w_t_p, b_p)

    # --- pallas_call 2: out = adj @ support ------------------------------------
    support_resident = n_sup * f_out_p * 2 <= support_resident_max_bytes
    if support_resident:
        s_spec = pl.BlockSpec((n_sup, f_out_p), lambda i, k: (0, 0))   # DMA'd once
    else:
        s_spec = pl.BlockSpec((tk, f_out_p), lambda i, k: (k, 0))      # streamed

    num_i = pl.cdiv(n, tm)
    sup_reads = 1 if support_resident else num_i
    agg_cost = pl.CostEstimate(
        flops=2 * n * n * f_out_p,
        bytes_accessed=(n * n * adj.dtype.itemsize              # adj read once
                        + sup_reads * n_sup * f_out_p * 2       # support reads
                        + n * f_out_p * 4),                     # output write
        transcendentals=0)

    out = pl.pallas_call(
        functools.partial(_aggregate_kernel, tk=tk, n_valid=n,
                          mask_cols=(n % tk) != 0,
                          support_resident=support_resident),
        out_shape=jax.ShapeDtypeStruct((n, f_out_p), jnp.float32),
        grid=(num_i, num_k),                   # contraction axis last
        in_specs=[
            pl.BlockSpec((tm, tk), lambda i, k: (i, k)),   # adj: the only big stream
            s_spec,
        ],
        out_specs=pl.BlockSpec((tm, f_out_p), lambda i, k: (i, 0)),
        compiler_params=pltpu.CompilerParams(
            dimension_semantics=("parallel", "arbitrary"),
            vmem_limit_bytes=vmem_limit_bytes),
        cost_estimate=agg_cost,
    )(adj, support)

    return out[:, :f_out]


# ---------------------------------------------------------------------------
# Self-test
# ---------------------------------------------------------------------------
def _bf16_reference(x, weight, bias, adj):
    # Same bf16-operand / f32-accumulate path as the kernels.
    sup = (jnp.dot(x.astype(jnp.bfloat16), weight.T.astype(jnp.bfloat16),
                   preferred_element_type=jnp.float32) + bias).astype(jnp.bfloat16)
    return jnp.dot(adj.astype(jnp.bfloat16), sup,
                   preferred_element_type=jnp.float32)


def _run_case(key, n, f_in, f_out, **kw):
    k_x, k_adj, k_w, k_b = jax.random.split(key, 4)
    x = jax.random.normal(k_x, (n, f_in), dtype=jnp.float32)
    adj = jax.random.uniform(k_adj, (n, n), dtype=jnp.float32)
    bound = 1.0 / (f_in ** 0.5)
    weight = jax.random.uniform(k_w, (f_out, f_in), minval=-bound, maxval=bound,
                                dtype=jnp.float32)
    bias = jax.random.uniform(k_b, (f_out,), minval=-bound, maxval=bound,
                              dtype=jnp.float32)

    out = jax.block_until_ready(gnn_layer(x, weight, bias, adj, **kw))
    assert out.shape == (n, f_out)
    assert out.dtype == jnp.float32

    ref = _bf16_reference(x, weight, bias, adj)
    assert jnp.allclose(out, ref, atol=2e-2, rtol=2e-2), (
        float(jnp.max(jnp.abs(out - ref))))
    # Loose sanity check against full-f32 math (bf16 operand rounding only).
    ref_f32 = adj @ (x @ weight.T + bias)
    assert jnp.allclose(out, ref_f32, atol=0.5, rtol=0.1)


if __name__ == "__main__":
    key = jax.random.PRNGKey(0)
    k1, k2 = jax.random.split(key)

    # NOTE: at these demo shapes every call collapses to one or a few grid
    # steps; the tiling pays off for graphs with thousands of nodes.
    _run_case(k1, n=16, f_in=32, f_out=32)                 # tiny, single block
    _run_case(k2, n=200, f_in=48, f_out=40,                # ragged edges + multi-
              tm=128, tk=128, tm_lin=128)                  # tile grid + col mask

    print("KERNEL_OK")
</pallas_src>

<mosaic_0001>
module attributes {stable_mosaic.version = 11 : i64} {
  func.func @_linear_kernel(%arg0: i32, %arg1: memref<16x32xbf16, #tpu.memory_space<vmem>>, %arg2: memref<32x128xbf16, #tpu.memory_space<vmem>>, %arg3: memref<1x128xf32, #tpu.memory_space<vmem>>, %arg4: memref<16x128xbf16, #tpu.memory_space<vmem>>) attributes {dimension_semantics = [#tpu.dimension_semantics<parallel>], iteration_bounds = array<i64: 1>, scalar_prefetch = 0 : i64, scratch_operands = 0 : i64, tpu.core_type = #tpu.core_type<tc>, window_params = [{transform_indices = @transform_0, window_bounds = array<i64: 16, 32>}, {pipeline_mode = #tpu.pipeline_mode<synchronous>, transform_indices = @transform_1, window_bounds = array<i64: 32, 128>}, {pipeline_mode = #tpu.pipeline_mode<synchronous>, transform_indices = @transform_2, window_bounds = array<i64: 1, 128>}, {transform_indices = @transform_3, window_bounds = array<i64: 16, 128>}]} {
    %c0 = arith.constant 0 : index
    %c0_0 = arith.constant 0 : index
    %0 = vector.load %arg1[%c0, %c0_0] : memref<16x32xbf16, #tpu.memory_space<vmem>>, vector<16x32xbf16>
    %c0_1 = arith.constant 0 : index
    %c0_2 = arith.constant 0 : index
    %1 = vector.load %arg2[%c0_1, %c0_2] : memref<32x128xbf16, #tpu.memory_space<vmem>>, vector<32x128xbf16>
    %cst = arith.constant dense<0.000000e+00> : vector<16x128xf32>
    %2 = tpu.matmul %0, %1, %cst {dimension_numbers = #tpu.dot_dimension_numbers<[1], [0], [0], [1], [0, 0, 1, 1], [], []>} : vector<16x32xbf16>, vector<32x128xbf16>, vector<16x128xf32> -> vector<16x128xf32>
    %c0_3 = arith.constant 0 : index
    %c0_4 = arith.constant 0 : index
    %3 = vector.load %arg3[%c0_3, %c0_4] : memref<1x128xf32, #tpu.memory_space<vmem>>, vector<1x128xf32>
    %4 = vector.broadcast %3 : vector<1x128xf32> to vector<16x128xf32>
    %5 = arith.addf %2, %4 : vector<16x128xf32>
    %6 = arith.truncf %5 : vector<16x128xf32> to vector<16x128xbf16>
    %c0_5 = arith.constant 0 : index
    %c0_6 = arith.constant 0 : index
    %7 = vector.load %arg4[%c0_5, %c0_6] : memref<16x128xbf16, #tpu.memory_space<vmem>>, vector<16x128xbf16>
    tpu.vector_store %arg4[%c0_5, %c0_6], %6 {strides = array<i32>} : memref<16x128xbf16, #tpu.memory_space<vmem>>, vector<16x128xbf16>,
    return
  }
  func.func @transform_0(%arg0: i32) -> (i32, i32) {
    %c0_i32 = arith.constant 0 : i32
    %c0_i32_0 = arith.constant 0 : i32
    return %arg0, %c0_i32 : i32, i32
  }
  func.func @transform_1(%arg0: i32) -> (i32, i32) {
    %c0_i32 = arith.constant 0 : i32
    %c0_i32_0 = arith.constant 0 : i32
    %c0_i32_1 = arith.constant 0 : i32
    return %c0_i32, %c0_i32_0 : i32, i32
  }
  func.func @transform_2(%arg0: i32) -> (i32, i32) {
    %c0_i32 = arith.constant 0 : i32
    %c0_i32_0 = arith.constant 0 : i32
    %c0_i32_1 = arith.constant 0 : i32
    return %c0_i32, %c0_i32_0 : i32, i32
  }
  func.func @transform_3(%arg0: i32) -> (i32, i32) {
    %c0_i32 = arith.constant 0 : i32
    %c0_i32_0 = arith.constant 0 : i32
    return %arg0, %c0_i32 : i32, i32
  }
}

</mosaic_0001>

<bundles_post_ra>
// kernel: tpu_custom_call.1
= control target key start
LH: loop header
LB: loop body
LE: loop exit
PB: predicated region body
PF: predicated region fallthrough
CT: control target
= control target key end

     0   :  { %8 = vsyncpa [#allocation3], 0  ;;  %s296_s0 = inlined_call_operand.hbm [shape: bf16[16,32], index: 0, kind: input, shape index: {}]   ;;  %s297_s1 = inlined_call_operand.hbm [shape: bf16[32,128], index: 1, kind: input, shape index: {}]   ;;  %s298_s2 = inlined_call_operand.vmem [shape: f32[1,128], index: 2, kind: input, shape index: {}]   ;;  %s299_s3 = inlined_call_operand.hbm [shape: bf16[16,128], index: 3, kind: output, shape index: {}]  }
   0x1   :  { %9 = vsyncpa [#allocation6], 0 }
   0x2   :  { %10 = vsyncpa [#allocation4], 0  ;;  %s248_s12 = smov [#allocation2]  }
   0x3   :  { %s16_s13 = sshll.u32 %s248_s12, 4  ;;  %s17_s13 = int_to_ptr.vmem [resolvable:$true] %s16_s13 }
   0x4   :  { %s190_s14 = scalar_lea.vmem %s17_s13, 128  ;;  %p195_p1 = scmp.lt.s32.totalorder %s17_s13, %s17_s13 }
   0x5   :  { %p191_p0 = scmp.ne.s32.totalorder %s17_s13, %s190_s14  ;;  %p196_p2 = scmp.lt.s32.totalorder %s190_s14, %s190_s14 }
   0x7   :  { %p197_p3 = por %p196_p2, %p195_p1 }
   0x9   :  { %p198_p4 = pnand %p197_p3, %p191_p0 }
   0xb   :  { %201 = shalt.err (!%p198_p4)
}
   0xc   :  { %s249_s15 = smov 64   ;;  %s250_s16 = smov 4  }
   0xd   :  { %22 = dma.hbm_to_vmem [thread:$0]  %s296_s0, 128, %s17_s13, [#allocation3], %s249_s15, %s249_s15, %s250_s16  }
   0xe   :  { %s251_s19 = smov [#allocation5]  }
   0xf   :  { %s28_s20 = sshll.u32 %s251_s19, 4  ;;  %s29_s20 = int_to_ptr.vmem [resolvable:$true] %s28_s20 }
  0x10   :  { %s210_s21 = scalar_lea.vmem %s29_s20, 256  ;;  %p215_p6 = scmp.lt.s32.totalorder %s29_s20, %s29_s20 }
  0x11   :  { %p211_p5 = scmp.ne.s32.totalorder %s29_s20, %s210_s21  ;;  %p216_p7 = scmp.lt.s32.totalorder %s210_s21, %s210_s21 }
  0x13   :  { %p217_p8 = por %p216_p7, %p215_p6 }
  0x15   :  { %p218_p9 = pnand %p217_p8, %p211_p5 }
  0x17   :  { %221 = shalt.err (!%p218_p9)
}
  0x18   :  { %34 = dma.hbm_to_vmem [thread:$0]  %s297_s1, 256, %s29_s20, [#allocation6], %s249_s15, %s249_s15, %s250_s16  }
  0x19   :  { %242 = dma.done.wait [#allocation3], 128  }
  0x1a   :  { %243 = vsyncadd [#allocation3], 4294967168 }
  0x1b   :  { %244 = dma.done.wait [#allocation6], 256  }
  0x1c   :  { %245 = vsyncadd [#allocation6], 4294967040  ;;  %v252_v0 = vmov 0.0   ;;  %vm253_vm0 = vmmov 0   ;;  %v179_v1 = vld [vmem:[#allocation5 + $0x8] sm:$0xff]   ;;  %v180_v2 = vld [vmem:[#allocation5] sm:$0xff]  }
  0x1d   :  { %164 = vmatprep.subr.bf16.mxu0 %v252_v0  ;;  %168 = vmatprep.mubr.msk.bf16.mxu0 %vm253_vm0, %v252_v0  ;;  %v181_v3 = vld [vmem:[#allocation2] sm:$0xff]   ;;  %vm74_vm1 = vcmask 261120   ;;  %s254_s1 = smov [#allocation7]  }
  0x1e   :  { %165 = vmatpush3.bf16.msra.mxu0 %v179_v1  ;;  %v147_v5 = vld [vmem:[%s298_s2] ss:$0 sm:$0xff]  ;;  %s134_s25 = sshll.u32 %s254_s1, 4  ;;  %s135_s25 = int_to_ptr.vmem [resolvable:$true] %s134_s25 }
  0x1f   :  { %166 = vmatprep.subr.bf16.mxu0 %v252_v0  ;;  %s222_s26 = scalar_lea.vmem %s135_s25, 128  ;;  %p227_p11 = scmp.lt.s32.totalorder %s135_s25, %s135_s25 }
  0x20   :  { %p223_p10 = scmp.ne.s32.totalorder %s135_s25, %s222_s26  ;;  %p228_p12 = scmp.lt.s32.totalorder %s222_s26, %s222_s26 }
  0x22   :  { %167 = vmatpush3.bf16.msra.mxu0 %v180_v2  ;;  %p229_p13 = por %p228_p12, %p227_p11 }
  0x24   :  { %p230_p0 = pnand %p229_p13, %p223_p10 }
  0x25   :  { %169 = vmatmul.mubr.msk.bf16.vlgmr.msra.gmra.mxu0 %vm74_vm1, %v181_v3 }
  0xe5   :  { %v112_v4 = vpop.f32.mrf.mxu0 }
  0xe6   :  { %v113_v8 = vadd.f32 %v147_v5, %v112_v4 }
  0xe7   :  { %v170_v6 = vpop.f32.mrf.mxu0 }
  0xe9   :  { %v115_v7 = vpop.f32.mrf.mxu0 }
  0xea   :  { %v116_v9 = vadd.f32 %v147_v5, %v115_v7 }
  0xeb   :  { %v171_v10 = vpop.f32.mrf.mxu0 }
  0xec   :  { %v159_v11 = vpack.c.bf16 %v116_v9, %v113_v8 }
  0xee   :  { %160 = vst [vmem:[#allocation7] sm:$0xff] %v159_v11  }
  0xef   :  { %233 = shalt.err (!%p230_p0)
}
  0xf0   :  { %140 = dma.vmem_to_hbm [thread:$0]  %s135_s25, 128, %s299_s3, [#allocation4], %s249_s15, %s249_s15, %s250_s16  }
  0xf1   :  { %246 = dma.done.wait [#allocation4], 128  }
  0xf2   :  { %247 = vsyncadd [#allocation4], 4294967168 }
  0xf3   :  { %144 = vsyncpa [#allocation3], 1 }
  0xf4   :  { %145 = vsyncpa [#allocation6], 1 }
  0xf5   :  { %146 = vsyncpa [#allocation4], 1 }

</bundles_post_ra>
